<compile_context>
chip_gen: v7x
topology: tpu7x:2x2x1
jax: 0.10.0
libtpu: 0.0.40
codegen_flags: <defaults>
</compile_context>

<pallas_src>
import functools

import jax
import jax.numpy as jnp
from jax import lax
from jax.experimental import pallas as pl
from jax.experimental.pallas import tpu as pltpu


def mha_flash_kernel(xq_ref, xkv_ref, wq_ref, bq_ref, wkv_ref, bkv_ref,
                     wo_ref, bo_ref, o_ref,
                     q_s, m_s, l_s, acc_s, *,
                     n_heads, d_model, d_feature, tq, tkv):
    """Grid = (batch, q_tiles, kv_tiles); kv is the innermost reduction axis."""
    qi = pl.program_id(1)
    ki = pl.program_id(2)
    n_kv = pl.num_programs(2)
    H, D, Df = n_heads, d_model, d_feature
    scale = 1.0 / (d_model ** 0.5)      # PyTorch divides by sqrt(d_model)

    # ---- init: first KV step of every (batch, q_tile) -----------------------
    @pl.when(ki == 0)
    def _():
        xq = xq_ref[0].astype(jnp.bfloat16)                          # cast in VMEM
        q = jnp.dot(xq, wq_ref[...],
                    preferred_element_type=jnp.float32) + bq_ref[...]  # (Tq, D) f32
        q_s[...] = (q * scale).astype(jnp.bfloat16)                  # scale folded in once
        m_s[...] = jnp.full_like(m_s, -jnp.inf)
        l_s[...] = jnp.zeros_like(l_s)
        acc_s[...] = jnp.zeros_like(acc_s)

    # ---- online-softmax step; skip fully causally-masked KV tiles -----------
    @pl.when(ki <= qi)                                               # requires tq == tkv
    def _():
        xkv = xkv_ref[0].astype(jnp.bfloat16)                        # (Tkv, D)
        # Fused K/V projection: one (Tkv, D) x (D, 2D) MXU matmul, bf16 ops /
        # f32 accumulation / f32 bias, single bf16 cast for the whole tile.
        kv = (jnp.dot(xkv, wkv_ref[...], preferred_element_type=jnp.float32)
              + bkv_ref[...]).astype(jnp.bfloat16)                   # (Tkv, 2D)
        q_all = q_s[...]                                             # (Tq, D) bf16, pre-scaled

        row = qi * tq + lax.broadcasted_iota(jnp.int32, (tq, tkv), 0)
        col = ki * tkv + lax.broadcasted_iota(jnp.int32, (tq, tkv), 1)
        causal = col <= row

        # TODO(synk): static unroll is fine for small H; see header TODO.
        for h in range(H):
            q = q_all[:, h * Df:(h + 1) * Df]                        # (Tq, Df)
            k = kv[:, h * Df:(h + 1) * Df]                           # (Tkv, Df)
            v = kv[:, D + h * Df: D + (h + 1) * Df]                  # (Tkv, Df)

            # scores = q @ k^T, contracted on Df (no materialized transpose).
            s = lax.dot_general(q, k, (((1,), (1,)), ((), ())),
                                preferred_element_type=jnp.float32)  # (Tq, Tkv) f32
            # -inf mask is safe: the causal diagonal guarantees >= 1 unmasked
            # score per processed row.
            s = jnp.where(causal, s, -jnp.inf)

            m_prev = m_s[h]
            m_new = jnp.maximum(m_prev, s.max(axis=-1, keepdims=True))
            alpha = jnp.exp(m_prev - m_new)
            # TODO(synk): on v6e/v7x the exp could run in bf16 (~2x EUP); kept
            #             f32 so the same kernel stays correct/fast on v5e.
            p = jnp.exp(s - m_new)
            l_s[h] = alpha * l_s[h] + p.sum(axis=-1, keepdims=True)
            pv = jnp.dot(p.astype(jnp.bfloat16), v,
                         preferred_element_type=jnp.float32)         # (Tq, Df)
            acc_s[:, h * Df:(h + 1) * Df] = (
                alpha * acc_s[:, h * Df:(h + 1) * Df] + pv)
            m_s[h] = m_new

    # ---- finalize: normalize + ONE fused output projection ------------------
    @pl.when(ki == n_kv - 1)
    def _():
        for h in range(H):
            inv = pl.reciprocal(l_s[h], approx=True)                 # EUP slot (~1e-3 rel)
            acc_s[:, h * Df:(h + 1) * Df] = acc_s[:, h * Df:(h + 1) * Df] * inv
        heads = acc_s[...].astype(jnp.bfloat16)                      # (Tq, D): concat of heads
        out = jnp.dot(heads, wo_ref[...],
                      preferred_element_type=jnp.float32) + bo_ref[...]
        # attention / output dropout: identity at inference
        o_ref[0] = out.astype(o_ref.dtype)


def multi_head_attention(x, params, *, n_heads, q_tile=128, kv_tile=128):
    """x: (B, S, D) float32.  params: dict of stacked weights (see init_params)."""
    B, S, D = x.shape
    H = n_heads
    Df = D // H
    tq = min(q_tile, S)
    tkv = min(kv_tile, S)
    assert tq == tkv, "causal tile-skip assumes square tiles"
    assert S % tq == 0 and S % tkv == 0
    n_q = S // tq
    n_kv = S // tkv

    # ---- one-time weight re-layout (plain XLA; keep the whole call jitted) --
    def fuse_w(w):                               # (H, D, Df) -> (D, H*Df)
        return jnp.transpose(w, (1, 0, 2)).reshape(D, H * Df)

    def fuse_b(b):                               # (H, 1, Df) -> (1, H*Df)
        return b.reshape(1, H * Df)

    w_q = fuse_w(params["wq"]).astype(jnp.bfloat16)                  # (D, D)
    b_q = fuse_b(params["bq"]).astype(jnp.float32)                   # (1, D)
    w_kv = jnp.concatenate([fuse_w(params["wk"]), fuse_w(params["wv"])],
                           axis=1).astype(jnp.bfloat16)              # (D, 2D)
    b_kv = jnp.concatenate([fuse_b(params["bk"]), fuse_b(params["bv"])],
                           axis=1).astype(jnp.float32)               # (1, 2D)
    w_o = params["wo"].astype(jnp.bfloat16)                          # (D, D)
    b_o = params["bo"].astype(jnp.float32)                           # (1, D)

    kernel = functools.partial(mha_flash_kernel, n_heads=H, d_model=D,
                               d_feature=Df, tq=tq, tkv=tkv)

    # Constant-index weights/biases: single-buffer them (no wasted VMEM on a
    # second buffer that is never used).
    def const_spec(shape):
        return pl.BlockSpec(shape, lambda b, qi, ki: (0,) * len(shape),
                            pipeline_mode=pl.Buffered(1))

    # Advisory cost estimate for XLA's scheduler (causal ~halves the attn work).
    n_pairs = n_q * (n_q + 1) // 2
    flops = B * (2 * S * D * D                        # Q projection
                 + n_pairs * 2 * tkv * D * 2 * D      # K/V projection per processed tile
                 + n_pairs * 4 * tq * tkv * D         # scores + p@v over all heads
                 + 2 * S * D * D)                     # output projection
    transcendentals = B * n_pairs * tq * tkv * H
    bytes_accessed = (B * S * D * 4 * (1 + n_q)       # x: q tiles + kv re-reads
                      + 4 * D * D * 2 + 4 * D * 4     # weights / biases
                      + B * S * D * 4)                # output
    cost = pl.CostEstimate(flops=flops, transcendentals=transcendentals,
                           bytes_accessed=bytes_accessed)

    return pl.pallas_call(
        kernel,
        out_shape=jax.ShapeDtypeStruct((B, S, D), jnp.float32),
        grid=(B, n_q, n_kv),
        in_specs=[
            pl.BlockSpec((1, tq, D), lambda b, qi, ki: (b, qi, 0)),   # x (f32) -> Q tile
            pl.BlockSpec((1, tkv, D), lambda b, qi, ki: (b, ki, 0)),  # x (f32) -> K/V tile
            const_spec((D, D)),          # fused W_q   (bf16)
            const_spec((1, D)),          # fused b_q   (f32)
            const_spec((D, 2 * D)),      # fused W_kv  (bf16)
            const_spec((1, 2 * D)),      # fused b_kv  (f32)
            const_spec((D, D)),          # W_o         (bf16)
            const_spec((1, D)),          # b_o         (f32)
        ],
        out_specs=pl.BlockSpec((1, tq, D), lambda b, qi, ki: (b, qi, 0)),
        scratch_shapes=[
            pltpu.VMEM((tq, D), jnp.bfloat16),       # cached pre-scaled Q (all heads)
            pltpu.VMEM((H, tq, 1), jnp.float32),     # running max  m (per head)
            pltpu.VMEM((H, tq, 1), jnp.float32),     # running sum  l (per head)
            pltpu.VMEM((tq, D), jnp.float32),        # head-concat output accumulator
        ],
        compiler_params=pltpu.CompilerParams(
            dimension_semantics=("parallel", "parallel", "arbitrary")),
        cost_estimate=cost,
    )(x, x, w_q, b_q, w_kv, b_kv, w_o, b_o)


def reference(x, params, *, n_heads):
    """Pure-JAX f32 reference reproducing the PyTorch forward (eval mode)."""
    B, S, D = x.shape
    outs = []
    for h in range(n_heads):
        q = x @ params["wq"][h] + params["bq"][h]
        k = x @ params["wk"][h] + params["bk"][h]
        v = x @ params["wv"][h] + params["bv"][h]
        att = jnp.einsum("bqd,bkd->bqk", q, k)
        tril = jnp.tril(jnp.ones((S, S)))
        att = jnp.where(tril == 0, -jnp.inf, att)
        att = att / (D ** 0.5)
        att = jax.nn.softmax(att, axis=-1)
        outs.append(att @ v)
    cat = jnp.concatenate(outs, axis=-1)
    return cat @ params["wo"] + params["bo"]


def init_params(key, d_model, n_heads):
    Df = d_model // n_heads
    ks = jax.random.split(key, 8)
    s = 1.0 / (d_model ** 0.5)
    return {
        "wq": jax.random.normal(ks[0], (n_heads, d_model, Df), jnp.float32) * s,
        "wk": jax.random.normal(ks[1], (n_heads, d_model, Df), jnp.float32) * s,
        "wv": jax.random.normal(ks[2], (n_heads, d_model, Df), jnp.float32) * s,
        "bq": jax.random.normal(ks[3], (n_heads, 1, Df), jnp.float32) * s,
        "bk": jax.random.normal(ks[4], (n_heads, 1, Df), jnp.float32) * s,
        "bv": jax.random.normal(ks[5], (n_heads, 1, Df), jnp.float32) * s,
        "wo": jax.random.normal(ks[6], (d_model, d_model), jnp.float32) * s,
        "bo": jax.random.normal(ks[7], (1, d_model), jnp.float32) * s,
    }


if __name__ == "__main__":
    # small shapes: batch=2, seq=8, d_model=32, n_heads=4 (d_feature=8)
    B, S, D, H = 2, 8, 32, 4
    key = jax.random.PRNGKey(0)
    kx, kp = jax.random.split(key)
    x = jax.random.normal(kx, (B, S, D), jnp.float32)
    params = init_params(kp, D, H)

    # jit the whole thing so the one-time weight re-layout is amortized/folded.
    mha = jax.jit(functools.partial(multi_head_attention, n_heads=H))
    out = jax.block_until_ready(mha(x, params))

    ref = reference(x, params, n_heads=H)
    assert out.shape == (B, S, D)
    # bf16 matmul operands (f32 accumulation, f32 softmax) vs pure-f32 reference
    assert jnp.allclose(out, ref, atol=5e-2, rtol=5e-2), "mismatch vs reference"
    print("KERNEL_OK")
</pallas_src>

<mosaic_0001>
module attributes {stable_mosaic.version = 11 : i64} {
  func.func @mha_flash_kernel(%arg0: i32, %arg1: i32, %arg2: i32, %arg3: memref<1x8x32xf32, #tpu.memory_space<vmem>>, %arg4: memref<1x8x32xf32, #tpu.memory_space<vmem>>, %arg5: memref<32x32xbf16, #tpu.memory_space<vmem>>, %arg6: memref<1x32xf32, #tpu.memory_space<vmem>>, %arg7: memref<32x64xbf16, #tpu.memory_space<vmem>>, %arg8: memref<1x64xf32, #tpu.memory_space<vmem>>, %arg9: memref<32x32xbf16, #tpu.memory_space<vmem>>, %arg10: memref<1x32xf32, #tpu.memory_space<vmem>>, %arg11: memref<1x8x32xf32, #tpu.memory_space<vmem>>, %arg12: memref<8x32xbf16, #tpu.memory_space<vmem>>, %arg13: memref<4x8x1xf32, #tpu.memory_space<vmem>>, %arg14: memref<4x8x1xf32, #tpu.memory_space<vmem>>, %arg15: memref<8x32xf32, #tpu.memory_space<vmem>>) attributes {dimension_semantics = [#tpu.dimension_semantics<parallel>, #tpu.dimension_semantics<parallel>, #tpu.dimension_semantics<arbitrary>], iteration_bounds = array<i64: 2, 1, 1>, scalar_prefetch = 0 : i64, scratch_operands = 4 : i64, tpu.core_type = #tpu.core_type<tc>, window_params = [{transform_indices = @transform_0, window_bounds = array<i64: 1, 8, 32>}, {transform_indices = @transform_1, window_bounds = array<i64: 1, 8, 32>}, {pipeline_mode = #tpu.pipeline_mode<synchronous>, transform_indices = @transform_2, window_bounds = array<i64: 32, 32>}, {pipeline_mode = #tpu.pipeline_mode<synchronous>, transform_indices = @transform_3, window_bounds = array<i64: 1, 32>}, {pipeline_mode = #tpu.pipeline_mode<synchronous>, transform_indices = @transform_4, window_bounds = array<i64: 32, 64>}, {pipeline_mode = #tpu.pipeline_mode<synchronous>, transform_indices = @transform_5, window_bounds = array<i64: 1, 64>}, {pipeline_mode = #tpu.pipeline_mode<synchronous>, transform_indices = @transform_6, window_bounds = array<i64: 32, 32>}, {pipeline_mode = #tpu.pipeline_mode<synchronous>, transform_indices = @transform_7, window_bounds = array<i64: 1, 32>}, {transform_indices = @transform_8, window_bounds = array<i64: 1, 8, 32>}]} {
    %c0_i32 = arith.constant 0 : i32
    %0 = arith.cmpi eq, %arg2, %c0_i32 : i32
    %1 = arith.extui %0 : i1 to i32
    %c0_i32_0 = arith.constant 0 : i32
    %2 = arith.cmpi ne, %1, %c0_i32_0 : i32
    scf.if %2 {
      %c0 = arith.constant 0 : index
      %c0_4 = arith.constant 0 : index
      %c0_5 = arith.constant 0 : index
      %9 = vector.load %arg3[%c0, %c0_4, %c0_5] : memref<1x8x32xf32, #tpu.memory_space<vmem>>, vector<1x8x32xf32>
      %10 = vector.shape_cast %9 : vector<1x8x32xf32> to vector<8x32xf32>
      %11 = arith.truncf %10 : vector<8x32xf32> to vector<8x32xbf16>
      %c0_6 = arith.constant 0 : index
      %c0_7 = arith.constant 0 : index
      %12 = vector.load %arg5[%c0_6, %c0_7] : memref<32x32xbf16, #tpu.memory_space<vmem>>, vector<32x32xbf16>
      %cst = arith.constant dense<0.000000e+00> : vector<8x32xf32>
      %13 = tpu.matmul %11, %12, %cst {dimension_numbers = #tpu.dot_dimension_numbers<[1], [0], [0], [1], [0, 0, 1, 1], [], []>} : vector<8x32xbf16>, vector<32x32xbf16>, vector<8x32xf32> -> vector<8x32xf32>
      %c0_8 = arith.constant 0 : index
      %c0_9 = arith.constant 0 : index
      %14 = vector.load %arg6[%c0_8, %c0_9] : memref<1x32xf32, #tpu.memory_space<vmem>>, vector<1x32xf32>
      %15 = vector.broadcast %14 : vector<1x32xf32> to vector<8x32xf32>
      %16 = arith.addf %13, %15 : vector<8x32xf32>
      %cst_10 = arith.constant 0.176776692 : f32
      %17 = vector.broadcast %cst_10 : f32 to vector<8x32xf32>
      %18 = arith.mulf %16, %17 : vector<8x32xf32>
      %19 = arith.truncf %18 : vector<8x32xf32> to vector<8x32xbf16>
      %c0_11 = arith.constant 0 : index
      %c0_12 = arith.constant 0 : index
      %20 = vector.load %arg12[%c0_11, %c0_12] : memref<8x32xbf16, #tpu.memory_space<vmem>>, vector<8x32xbf16>
      tpu.vector_store %arg12[%c0_11, %c0_12], %19 {strides = array<i32>} : memref<8x32xbf16, #tpu.memory_space<vmem>>, vector<8x32xbf16>,
      %cst_13 = arith.constant 0xFF800000 : f32
      %21 = vector.broadcast %cst_13 : f32 to vector<4x8x1xf32>
      %c0_14 = arith.constant 0 : index
      %c0_15 = arith.constant 0 : index
      %c0_16 = arith.constant 0 : index
      %22 = vector.load %arg13[%c0_14, %c0_15, %c0_16] : memref<4x8x1xf32, #tpu.memory_space<vmem>>, vector<4x8x1xf32>
      tpu.vector_store %arg13[%c0_14, %c0_15, %c0_16], %21 {strides = array<i32>} : memref<4x8x1xf32, #tpu.memory_space<vmem>>, vector<4x8x1xf32>,
      %cst_17 = arith.constant 0.000000e+00 : f32
      %23 = vector.broadcast %cst_17 : f32 to vector<4x8x1xf32>
      %c0_18 = arith.constant 0 : index
      %c0_19 = arith.constant 0 : index
      %c0_20 = arith.constant 0 : index
      %24 = vector.load %arg14[%c0_18, %c0_19, %c0_20] : memref<4x8x1xf32, #tpu.memory_space<vmem>>, vector<4x8x1xf32>
      tpu.vector_store %arg14[%c0_18, %c0_19, %c0_20], %23 {strides = array<i32>} : memref<4x8x1xf32, #tpu.memory_space<vmem>>, vector<4x8x1xf32>,
      %cst_21 = arith.constant 0.000000e+00 : f32
      %25 = vector.broadcast %cst_21 : f32 to vector<8x32xf32>
      %c0_22 = arith.constant 0 : index
      %c0_23 = arith.constant 0 : index
      %26 = vector.load %arg15[%c0_22, %c0_23] : memref<8x32xf32, #tpu.memory_space<vmem>>, vector<8x32xf32>
      tpu.vector_store %arg15[%c0_22, %c0_23], %25 {strides = array<i32>} : memref<8x32xf32, #tpu.memory_space<vmem>>, vector<8x32xf32>,
    } else {
    }
    %3 = arith.cmpi sle, %arg2, %arg1 : i32
    %4 = arith.extui %3 : i1 to i32
    %c0_i32_1 = arith.constant 0 : i32
    %5 = arith.cmpi ne, %4, %c0_i32_1 : i32
    scf.if %5 {
      %c0 = arith.constant 0 : index
      %c0_4 = arith.constant 0 : index
      %c0_5 = arith.constant 0 : index
      %9 = vector.load %arg4[%c0, %c0_4, %c0_5] : memref<1x8x32xf32, #tpu.memory_space<vmem>>, vector<1x8x32xf32>
      %10 = vector.shape_cast %9 : vector<1x8x32xf32> to vector<8x32xf32>
      %11 = arith.truncf %10 : vector<8x32xf32> to vector<8x32xbf16>
      %c0_6 = arith.constant 0 : index
      %c0_7 = arith.constant 0 : index
      %12 = vector.load %arg7[%c0_6, %c0_7] : memref<32x64xbf16, #tpu.memory_space<vmem>>, vector<32x64xbf16>
      %cst = arith.constant dense<0.000000e+00> : vector<8x64xf32>
      %13 = tpu.matmul %11, %12, %cst {dimension_numbers = #tpu.dot_dimension_numbers<[1], [0], [0], [1], [0, 0, 1, 1], [], []>} : vector<8x32xbf16>, vector<32x64xbf16>, vector<8x64xf32> -> vector<8x64xf32>
      %c0_8 = arith.constant 0 : index
      %c0_9 = arith.constant 0 : index
      %14 = vector.load %arg8[%c0_8, %c0_9] : memref<1x64xf32, #tpu.memory_space<vmem>>, vector<1x64xf32>
      %15 = vector.broadcast %14 : vector<1x64xf32> to vector<8x64xf32>
      %16 = arith.addf %13, %15 : vector<8x64xf32>
      %17 = arith.truncf %16 : vector<8x64xf32> to vector<8x64xbf16>
      %c0_10 = arith.constant 0 : index
      %c0_11 = arith.constant 0 : index
      %18 = vector.load %arg12[%c0_10, %c0_11] : memref<8x32xbf16, #tpu.memory_space<vmem>>, vector<8x32xbf16>
      %c8_i32 = arith.constant 8 : i32
      %19 = arith.muli %arg1, %c8_i32 : i32
      %20 = tpu.iota {dimensions = array<i32: 0>} : vector<8x8xi32>
      %21 = vector.broadcast %19 : i32 to vector<8x8xi32>
      %22 = arith.addi %21, %20 : vector<8x8xi32>
      %c8_i32_12 = arith.constant 8 : i32
      %23 = arith.muli %arg2, %c8_i32_12 : i32
      %24 = tpu.iota {dimensions = array<i32: 1>} : vector<8x8xi32>
      %25 = vector.broadcast %23 : i32 to vector<8x8xi32>
      %26 = arith.addi %25, %24 : vector<8x8xi32>
      %27 = arith.cmpi sle, %26, %22 : vector<8x8xi32>
      %28 = vector.extract_strided_slice %18 {offsets = [0, 0], sizes = [8, 8], strides = [1, 1]} : vector<8x32xbf16> to vector<8x8xbf16>
      %29 = vector.extract_strided_slice %17 {offsets = [0, 0], sizes = [8, 8], strides = [1, 1]} : vector<8x64xbf16> to vector<8x8xbf16>
      %30 = vector.extract_strided_slice %17 {offsets = [0, 32], sizes = [8, 8], strides = [1, 1]} : vector<8x64xbf16> to vector<8x8xbf16>
      %cst_13 = arith.constant dense<0.000000e+00> : vector<8x8xf32>
      %31 = tpu.matmul %28, %29, %cst_13 {dimension_numbers = #tpu.dot_dimension_numbers<[1], [1], [0], [0], [0, 0, 1, 0], [], []>} : vector<8x8xbf16>, vector<8x8xbf16>, vector<8x8xf32> -> vector<8x8xf32>
      %cst_14 = arith.constant 0xFF800000 : f32
      %32 = vector.broadcast %cst_14 : f32 to vector<8x8xf32>
      %33 = arith.select %27, %31, %32 : vector<8x8xi1>, vector<8x8xf32>
      %c0_15 = arith.constant 0 : index
      %c0_16 = arith.constant 0 : index
      %c0_17 = arith.constant 0 : index
      %34 = vector.load %arg13[%c0_15, %c0_16, %c0_17] : memref<4x8x1xf32, #tpu.memory_space<vmem>>, vector<1x8x1xf32>
      %35 = vector.shape_cast %34 : vector<1x8x1xf32> to vector<8x1xf32>
      %cst_18 = arith.constant dense<0xFF800000> : vector<8xf32>
      %36 = vector.multi_reduction <maximumf>, %33, %cst_18 [1] : vector<8x8xf32> to vector<8xf32>
      %37 = vector.shape_cast %36 : vector<8xf32> to vector<8x1xf32>
      %38 = arith.maximumf %35, %37 : vector<8x1xf32>
      %39 = arith.subf %35, %38 : vector<8x1xf32>
      %40 = math.exp %39 : vector<8x1xf32>
      %41 = vector.broadcast %38 : vector<8x1xf32> to vector<8x8xf32>
      %42 = arith.subf %33, %41 : vector<8x8xf32>
      %43 = math.exp %42 : vector<8x8xf32>
      %c0_19 = arith.constant 0 : index
      %c0_20 = arith.constant 0 : index
      %c0_21 = arith.constant 0 : index
      %44 = vector.load %arg14[%c0_19, %c0_20, %c0_21] : memref<4x8x1xf32, #tpu.memory_space<vmem>>, vector<1x8x1xf32>
      %45 = vector.shape_cast %44 : vector<1x8x1xf32> to vector<8x1xf32>
      %46 = arith.mulf %40, %45 : vector<8x1xf32>
      %cst_22 = arith.constant dense<0.000000e+00> : vector<8xf32>
      %47 = vector.multi_reduction <add>, %43, %cst_22 [1] : vector<8x8xf32> to vector<8xf32>
      %48 = vector.shape_cast %47 : vector<8xf32> to vector<8x1xf32>
      %49 = arith.addf %46, %48 : vector<8x1xf32>
      %c0_23 = arith.constant 0 : index
      %c0_24 = arith.constant 0 : index
      %c0_25 = arith.constant 0 : index
      %50 = vector.load %arg14[%c0_23, %c0_24, %c0_25] : memref<4x8x1xf32, #tpu.memory_space<vmem>>, vector<1x8x1xf32>
      %51 = vector.shape_cast %50 : vector<1x8x1xf32> to vector<8x1xf32>
      %52 = vector.shape_cast %49 : vector<8x1xf32> to vector<1x8x1xf32>
      tpu.vector_store %arg14[%c0_23, %c0_24, %c0_25], %52 {strides = array<i32>} : memref<4x8x1xf32, #tpu.memory_space<vmem>>, vector<1x8x1xf32>,
      %53 = arith.truncf %43 : vector<8x8xf32> to vector<8x8xbf16>
      %cst_26 = arith.constant dense<0.000000e+00> : vector<8x8xf32>
      %54 = tpu.matmul %53, %30, %cst_26 {dimension_numbers = #tpu.dot_dimension_numbers<[1], [0], [0], [1], [0, 0, 1, 1], [], []>} : vector<8x8xbf16>, vector<8x8xbf16>, vector<8x8xf32> -> vector<8x8xf32>
      %c0_27 = arith.constant 0 : index
      %c0_28 = arith.constant 0 : index
      %55 = vector.load %arg15[%c0_27, %c0_28] : memref<8x32xf32, #tpu.memory_space<vmem>>, vector<8x8xf32>
      %56 = vector.broadcast %40 : vector<8x1xf32> to vector<8x8xf32>
      %57 = arith.mulf %56, %55 : vector<8x8xf32>
      %58 = arith.addf %57, %54 : vector<8x8xf32>
      %c0_29 = arith.constant 0 : index
      %c0_30 = arith.constant 0 : index
      %59 = vector.load %arg15[%c0_29, %c0_30] : memref<8x32xf32, #tpu.memory_space<vmem>>, vector<8x8xf32>
      tpu.vector_store %arg15[%c0_29, %c0_30], %58 {strides = array<i32>} : memref<8x32xf32, #tpu.memory_space<vmem>>, vector<8x8xf32>,
      %c0_31 = arith.constant 0 : index
      %c0_32 = arith.constant 0 : index
      %c0_33 = arith.constant 0 : index
      %60 = vector.load %arg13[%c0_31, %c0_32, %c0_33] : memref<4x8x1xf32, #tpu.memory_space<vmem>>, vector<1x8x1xf32>
      %61 = vector.shape_cast %60 : vector<1x8x1xf32> to vector<8x1xf32>
      %62 = vector.shape_cast %38 : vector<8x1xf32> to vector<1x8x1xf32>
      tpu.vector_store %arg13[%c0_31, %c0_32, %c0_33], %62 {strides = array<i32>} : memref<4x8x1xf32, #tpu.memory_space<vmem>>, vector<1x8x1xf32>,
      %63 = vector.extract_strided_slice %18 {offsets = [0, 8], sizes = [8, 8], strides = [1, 1]} : vector<8x32xbf16> to vector<8x8xbf16>
      %64 = vector.extract_strided_slice %17 {offsets = [0, 8], sizes = [8, 8], strides = [1, 1]} : vector<8x64xbf16> to vector<8x8xbf16>
      %65 = vector.extract_strided_slice %17 {offsets = [0, 40], sizes = [8, 8], strides = [1, 1]} : vector<8x64xbf16> to vector<8x8xbf16>
      %cst_34 = arith.constant dense<0.000000e+00> : vector<8x8xf32>
      %66 = tpu.matmul %63, %64, %cst_34 {dimension_numbers = #tpu.dot_dimension_numbers<[1], [1], [0], [0], [0, 0, 1, 0], [], []>} : vector<8x8xbf16>, vector<8x8xbf16>, vector<8x8xf32> -> vector<8x8xf32>
      %cst_35 = arith.constant 0xFF800000 : f32
      %67 = vector.broadcast %cst_35 : f32 to vector<8x8xf32>
      %68 = arith.select %27, %66, %67 : vector<8x8xi1>, vector<8x8xf32>
      %c1 = arith.constant 1 : index
      %c0_36 = arith.constant 0 : index
      %c0_37 = arith.constant 0 : index
      %69 = vector.load %arg13[%c1, %c0_36, %c0_37] : memref<4x8x1xf32, #tpu.memory_space<vmem>>, vector<1x8x1xf32>
      %70 = vector.shape_cast %69 : vector<1x8x1xf32> to vector<8x1xf32>
      %cst_38 = arith.constant dense<0xFF800000> : vector<8xf32>
      %71 = vector.multi_reduction <maximumf>, %68, %cst_38 [1] : vector<8x8xf32> to vector<8xf32>
      %72 = vector.shape_cast %71 : vector<8xf32> to vector<8x1xf32>
      %73 = arith.maximumf %70, %72 : vector<8x1xf32>
      %74 = arith.subf %70, %73 : vector<8x1xf32>
      %75 = math.exp %74 : vector<8x1xf32>
      %76 = vector.broadcast %73 : vector<8x1xf32> to vector<8x8xf32>
      %77 = arith.subf %68, %76 : vector<8x8xf32>
      %78 = math.exp %77 : vector<8x8xf32>
      %c1_39 = arith.constant 1 : index
      %c0_40 = arith.constant 0 : index
      %c0_41 = arith.constant 0 : index
      %79 = vector.load %arg14[%c1_39, %c0_40, %c0_41] : memref<4x8x1xf32, #tpu.memory_space<vmem>>, vector<1x8x1xf32>
      %80 = vector.shape_cast %79 : vector<1x8x1xf32> to vector<8x1xf32>
      %81 = arith.mulf %75, %80 : vector<8x1xf32>
      %cst_42 = arith.constant dense<0.000000e+00> : vector<8xf32>
      %82 = vector.multi_reduction <add>, %78, %cst_42 [1] : vector<8x8xf32> to vector<8xf32>
      %83 = vector.shape_cast %82 : vector<8xf32> to vector<8x1xf32>
      %84 = arith.addf %81, %83 : vector<8x1xf32>
      %c1_43 = arith.constant 1 : index
      %c0_44 = arith.constant 0 : index
      %c0_45 = arith.constant 0 : index
      %85 = vector.load %arg14[%c1_43, %c0_44, %c0_45] : memref<4x8x1xf32, #tpu.memory_space<vmem>>, vector<1x8x1xf32>
      %86 = vector.shape_cast %85 : vector<1x8x1xf32> to vector<8x1xf32>
      %87 = vector.shape_cast %84 : vector<8x1xf32> to vector<1x8x1xf32>
      tpu.vector_store %arg14[%c1_43, %c0_44, %c0_45], %87 {strides = array<i32>} : memref<4x8x1xf32, #tpu.memory_space<vmem>>, vector<1x8x1xf32>,
      %88 = arith.truncf %78 : vector<8x8xf32> to vector<8x8xbf16>
      %cst_46 = arith.constant dense<0.000000e+00> : vector<8x8xf32>
      %89 = tpu.matmul %88, %65, %cst_46 {dimension_numbers = #tpu.dot_dimension_numbers<[1], [0], [0], [1], [0, 0, 1, 1], [], []>} : vector<8x8xbf16>, vector<8x8xbf16>, vector<8x8xf32> -> vector<8x8xf32>
      %c0_47 = arith.constant 0 : index
      %c8 = arith.constant 8 : index
      %90 = vector.load %arg15[%c0_47, %c8] : memref<8x32xf32, #tpu.memory_space<vmem>>, vector<8x8xf32>
      %91 = vector.broadcast %75 : vector<8x1xf32> to vector<8x8xf32>
      %92 = arith.mulf %91, %90 : vector<8x8xf32>
      %93 = arith.addf %92, %89 : vector<8x8xf32>
      %c0_48 = arith.constant 0 : index
      %c8_49 = arith.constant 8 : index
      %94 = vector.load %arg15[%c0_48, %c8_49] : memref<8x32xf32, #tpu.memory_space<vmem>>, vector<8x8xf32>
      tpu.vector_store %arg15[%c0_48, %c8_49], %93 {strides = array<i32>} : memref<8x32xf32, #tpu.memory_space<vmem>>, vector<8x8xf32>,
      %c1_50 = arith.constant 1 : index
      %c0_51 = arith.constant 0 : index
      %c0_52 = arith.constant 0 : index
      %95 = vector.load %arg13[%c1_50, %c0_51, %c0_52] : memref<4x8x1xf32, #tpu.memory_space<vmem>>, vector<1x8x1xf32>
      %96 = vector.shape_cast %95 : vector<1x8x1xf32> to vector<8x1xf32>
      %97 = vector.shape_cast %73 : vector<8x1xf32> to vector<1x8x1xf32>
      tpu.vector_store %arg13[%c1_50, %c0_51, %c0_52], %97 {strides = array<i32>} : memref<4x8x1xf32, #tpu.memory_space<vmem>>, vector<1x8x1xf32>,
      %98 = vector.extract_strided_slice %18 {offsets = [0, 16], sizes = [8, 8], strides = [1, 1]} : vector<8x32xbf16> to vector<8x8xbf16>
      %99 = vector.extract_strided_slice %17 {offsets = [0, 16], sizes = [8, 8], strides = [1, 1]} : vector<8x64xbf16> to vector<8x8xbf16>
      %100 = vector.extract_strided_slice %17 {offsets = [0, 48], sizes = [8, 8], strides = [1, 1]} : vector<8x64xbf16> to vector<8x8xbf16>
      %cst_53 = arith.constant dense<0.000000e+00> : vector<8x8xf32>
      %101 = tpu.matmul %98, %99, %cst_53 {dimension_numbers = #tpu.dot_dimension_numbers<[1], [1], [0], [0], [0, 0, 1, 0], [], []>} : vector<8x8xbf16>, vector<8x8xbf16>, vector<8x8xf32> -> vector<8x8xf32>
      %cst_54 = arith.constant 0xFF800000 : f32
      %102 = vector.broadcast %cst_54 : f32 to vector<8x8xf32>
      %103 = arith.select %27, %101, %102 : vector<8x8xi1>, vector<8x8xf32>
      %c2 = arith.constant 2 : index
      %c0_55 = arith.constant 0 : index
      %c0_56 = arith.constant 0 : index
      %104 = vector.load %arg13[%c2, %c0_55, %c0_56] : memref<4x8x1xf32, #tpu.memory_space<vmem>>, vector<1x8x1xf32>
      %105 = vector.shape_cast %104 : vector<1x8x1xf32> to vector<8x1xf32>
      %cst_57 = arith.constant dense<0xFF800000> : vector<8xf32>
      %106 = vector.multi_reduction <maximumf>, %103, %cst_57 [1] : vector<8x8xf32> to vector<8xf32>
      %107 = vector.shape_cast %106 : vector<8xf32> to vector<8x1xf32>
      %108 = arith.maximumf %105, %107 : vector<8x1xf32>
      %109 = arith.subf %105, %108 : vector<8x1xf32>
      %110 = math.exp %109 : vector<8x1xf32>
      %111 = vector.broadcast %108 : vector<8x1xf32> to vector<8x8xf32>
      %112 = arith.subf %103, %111 : vector<8x8xf32>
      %113 = math.exp %112 : vector<8x8xf32>
      %c2_58 = arith.constant 2 : index
      %c0_59 = arith.constant 0 : index
      %c0_60 = arith.constant 0 : index
      %114 = vector.load %arg14[%c2_58, %c0_59, %c0_60] : memref<4x8x1xf32, #tpu.memory_space<vmem>>, vector<1x8x1xf32>
      %115 = vector.shape_cast %114 : vector<1x8x1xf32> to vector<8x1xf32>
      %116 = arith.mulf %110, %115 : vector<8x1xf32>
      %cst_61 = arith.constant dense<0.000000e+00> : vector<8xf32>
      %117 = vector.multi_reduction <add>, %113, %cst_61 [1] : vector<8x8xf32> to vector<8xf32>
      %118 = vector.shape_cast %117 : vector<8xf32> to vector<8x1xf32>
      %119 = arith.addf %116, %118 : vector<8x1xf32>
      %c2_62 = arith.constant 2 : index
      %c0_63 = arith.constant 0 : index
      %c0_64 = arith.constant 0 : index
      %120 = vector.load %arg14[%c2_62, %c0_63, %c0_64] : memref<4x8x1xf32, #tpu.memory_space<vmem>>, vector<1x8x1xf32>
      %121 = vector.shape_cast %120 : vector<1x8x1xf32> to vector<8x1xf32>
      %122 = vector.shape_cast %119 : vector<8x1xf32> to vector<1x8x1xf32>
      tpu.vector_store %arg14[%c2_62, %c0_63, %c0_64], %122 {strides = array<i32>} : memref<4x8x1xf32, #tpu.memory_space<vmem>>, vector<1x8x1xf32>,
      %123 = arith.truncf %113 : vector<8x8xf32> to vector<8x8xbf16>
      %cst_65 = arith.constant dense<0.000000e+00> : vector<8x8xf32>
      %124 = tpu.matmul %123, %100, %cst_65 {dimension_numbers = #tpu.dot_dimension_numbers<[1], [0], [0], [1], [0, 0, 1, 1], [], []>} : vector<8x8xbf16>, vector<8x8xbf16>, vector<8x8xf32> -> vector<8x8xf32>
      %c0_66 = arith.constant 0 : index
      %c16 = arith.constant 16 : index
      %125 = vector.load %arg15[%c0_66, %c16] : memref<8x32xf32, #tpu.memory_space<vmem>>, vector<8x8xf32>
      %126 = vector.broadcast %110 : vector<8x1xf32> to vector<8x8xf32>
      %127 = arith.mulf %126, %125 : vector<8x8xf32>
      %128 = arith.addf %127, %124 : vector<8x8xf32>
      %c0_67 = arith.constant 0 : index
      %c16_68 = arith.constant 16 : index
      %129 = vector.load %arg15[%c0_67, %c16_68] : memref<8x32xf32, #tpu.memory_space<vmem>>, vector<8x8xf32>
      tpu.vector_store %arg15[%c0_67, %c16_68], %128 {strides = array<i32>} : memref<8x32xf32, #tpu.memory_space<vmem>>, vector<8x8xf32>,
      %c2_69 = arith.constant 2 : index
      %c0_70 = arith.constant 0 : index
      %c0_71 = arith.constant 0 : index
      %130 = vector.load %arg13[%c2_69, %c0_70, %c0_71] : memref<4x8x1xf32, #tpu.memory_space<vmem>>, vector<1x8x1xf32>
      %131 = vector.shape_cast %130 : vector<1x8x1xf32> to vector<8x1xf32>
      %132 = vector.shape_cast %108 : vector<8x1xf32> to vector<1x8x1xf32>
      tpu.vector_store %arg13[%c2_69, %c0_70, %c0_71], %132 {strides = array<i32>} : memref<4x8x1xf32, #tpu.memory_space<vmem>>, vector<1x8x1xf32>,
      %133 = vector.extract_strided_slice %18 {offsets = [0, 24], sizes = [8, 8], strides = [1, 1]} : vector<8x32xbf16> to vector<8x8xbf16>
      %134 = vector.extract_strided_slice %17 {offsets = [0, 24], sizes = [8, 8], strides = [1, 1]} : vector<8x64xbf16> to vector<8x8xbf16>
      %135 = vector.extract_strided_slice %17 {offsets = [0, 56], sizes = [8, 8], strides = [1, 1]} : vector<8x64xbf16> to vector<8x8xbf16>
      %cst_72 = arith.constant dense<0.000000e+00> : vector<8x8xf32>
      %136 = tpu.matmul %133, %134, %cst_72 {dimension_numbers = #tpu.dot_dimension_numbers<[1], [1], [0], [0], [0, 0, 1, 0], [], []>} : vector<8x8xbf16>, vector<8x8xbf16>, vector<8x8xf32> -> vector<8x8xf32>
      %cst_73 = arith.constant 0xFF800000 : f32
      %137 = vector.broadcast %cst_73 : f32 to vector<8x8xf32>
      %138 = arith.select %27, %136, %137 : vector<8x8xi1>, vector<8x8xf32>
      %c3 = arith.constant 3 : index
      %c0_74 = arith.constant 0 : index
      %c0_75 = arith.constant 0 : index
      %139 = vector.load %arg13[%c3, %c0_74, %c0_75] : memref<4x8x1xf32, #tpu.memory_space<vmem>>, vector<1x8x1xf32>
      %140 = vector.shape_cast %139 : vector<1x8x1xf32> to vector<8x1xf32>
      %cst_76 = arith.constant dense<0xFF800000> : vector<8xf32>
      %141 = vector.multi_reduction <maximumf>, %138, %cst_76 [1] : vector<8x8xf32> to vector<8xf32>
      %142 = vector.shape_cast %141 : vector<8xf32> to vector<8x1xf32>
      %143 = arith.maximumf %140, %142 : vector<8x1xf32>
      %144 = arith.subf %140, %143 : vector<8x1xf32>
      %145 = math.exp %144 : vector<8x1xf32>
      %146 = vector.broadcast %143 : vector<8x1xf32> to vector<8x8xf32>
      %147 = arith.subf %138, %146 : vector<8x8xf32>
      %148 = math.exp %147 : vector<8x8xf32>
      %c3_77 = arith.constant 3 : index
      %c0_78 = arith.constant 0 : index
      %c0_79 = arith.constant 0 : index
      %149 = vector.load %arg14[%c3_77, %c0_78, %c0_79] : memref<4x8x1xf32, #tpu.memory_space<vmem>>, vector<1x8x1xf32>
      %150 = vector.shape_cast %149 : vector<1x8x1xf32> to vector<8x1xf32>
      %151 = arith.mulf %145, %150 : vector<8x1xf32>
      %cst_80 = arith.constant dense<0.000000e+00> : vector<8xf32>
      %152 = vector.multi_reduction <add>, %148, %cst_80 [1] : vector<8x8xf32> to vector<8xf32>
      %153 = vector.shape_cast %152 : vector<8xf32> to vector<8x1xf32>
      %154 = arith.addf %151, %153 : vector<8x1xf32>
      %c3_81 = arith.constant 3 : index
      %c0_82 = arith.constant 0 : index
      %c0_83 = arith.constant 0 : index
      %155 = vector.load %arg14[%c3_81, %c0_82, %c0_83] : memref<4x8x1xf32, #tpu.memory_space<vmem>>, vector<1x8x1xf32>
      %156 = vector.shape_cast %155 : vector<1x8x1xf32> to vector<8x1xf32>
      %157 = vector.shape_cast %154 : vector<8x1xf32> to vector<1x8x1xf32>
      tpu.vector_store %arg14[%c3_81, %c0_82, %c0_83], %157 {strides = array<i32>} : memref<4x8x1xf32, #tpu.memory_space<vmem>>, vector<1x8x1xf32>,
      %158 = arith.truncf %148 : vector<8x8xf32> to vector<8x8xbf16>
      %cst_84 = arith.constant dense<0.000000e+00> : vector<8x8xf32>
      %159 = tpu.matmul %158, %135, %cst_84 {dimension_numbers = #tpu.dot_dimension_numbers<[1], [0], [0], [1], [0, 0, 1, 1], [], []>} : vector<8x8xbf16>, vector<8x8xbf16>, vector<8x8xf32> -> vector<8x8xf32>
      %c0_85 = arith.constant 0 : index
      %c24 = arith.constant 24 : index
      %160 = vector.load %arg15[%c0_85, %c24] : memref<8x32xf32, #tpu.memory_space<vmem>>, vector<8x8xf32>
      %161 = vector.broadcast %145 : vector<8x1xf32> to vector<8x8xf32>
      %162 = arith.mulf %161, %160 : vector<8x8xf32>
      %163 = arith.addf %162, %159 : vector<8x8xf32>
      %c0_86 = arith.constant 0 : index
      %c24_87 = arith.constant 24 : index
      %164 = vector.load %arg15[%c0_86, %c24_87] : memref<8x32xf32, #tpu.memory_space<vmem>>, vector<8x8xf32>
      tpu.vector_store %arg15[%c0_86, %c24_87], %163 {strides = array<i32>} : memref<8x32xf32, #tpu.memory_space<vmem>>, vector<8x8xf32>,
      %c3_88 = arith.constant 3 : index
      %c0_89 = arith.constant 0 : index
      %c0_90 = arith.constant 0 : index
      %165 = vector.load %arg13[%c3_88, %c0_89, %c0_90] : memref<4x8x1xf32, #tpu.memory_space<vmem>>, vector<1x8x1xf32>
      %166 = vector.shape_cast %165 : vector<1x8x1xf32> to vector<8x1xf32>
      %167 = vector.shape_cast %143 : vector<8x1xf32> to vector<1x8x1xf32>
      tpu.vector_store %arg13[%c3_88, %c0_89, %c0_90], %167 {strides = array<i32>} : memref<4x8x1xf32, #tpu.memory_space<vmem>>, vector<1x8x1xf32>,
    } else {
    }
    %c0_i32_2 = arith.constant 0 : i32
    %6 = arith.cmpi eq, %arg2, %c0_i32_2 : i32
    %7 = arith.extui %6 : i1 to i32
    %c0_i32_3 = arith.constant 0 : i32
    %8 = arith.cmpi ne, %7, %c0_i32_3 : i32
    scf.if %8 {
      %c0 = arith.constant 0 : index
      %c0_4 = arith.constant 0 : index
      %c0_5 = arith.constant 0 : index
      %9 = vector.load %arg14[%c0, %c0_4, %c0_5] : memref<4x8x1xf32, #tpu.memory_space<vmem>>, vector<1x8x1xf32>
      %10 = vector.shape_cast %9 : vector<1x8x1xf32> to vector<8x1xf32>
      %11 = tpu.reciprocal %10 {approx = true} : vector<8x1xf32> -> vector<8x1xf32>
      %c0_6 = arith.constant 0 : index
      %c0_7 = arith.constant 0 : index
      %12 = vector.load %arg15[%c0_6, %c0_7] : memref<8x32xf32, #tpu.memory_space<vmem>>, vector<8x8xf32>
      %13 = vector.broadcast %11 : vector<8x1xf32> to vector<8x8xf32>
      %14 = arith.mulf %12, %13 : vector<8x8xf32>
      %c0_8 = arith.constant 0 : index
      %c0_9 = arith.constant 0 : index
      %15 = vector.load %arg15[%c0_8, %c0_9] : memref<8x32xf32, #tpu.memory_space<vmem>>, vector<8x8xf32>
      tpu.vector_store %arg15[%c0_8, %c0_9], %14 {strides = array<i32>} : memref<8x32xf32, #tpu.memory_space<vmem>>, vector<8x8xf32>,
      %c1 = arith.constant 1 : index
      %c0_10 = arith.constant 0 : index
      %c0_11 = arith.constant 0 : index
      %16 = vector.load %arg14[%c1, %c0_10, %c0_11] : memref<4x8x1xf32, #tpu.memory_space<vmem>>, vector<1x8x1xf32>
      %17 = vector.shape_cast %16 : vector<1x8x1xf32> to vector<8x1xf32>
      %18 = tpu.reciprocal %17 {approx = true} : vector<8x1xf32> -> vector<8x1xf32>
      %c0_12 = arith.constant 0 : index
      %c8 = arith.constant 8 : index
      %19 = vector.load %arg15[%c0_12, %c8] : memref<8x32xf32, #tpu.memory_space<vmem>>, vector<8x8xf32>
      %20 = vector.broadcast %18 : vector<8x1xf32> to vector<8x8xf32>
      %21 = arith.mulf %19, %20 : vector<8x8xf32>
      %c0_13 = arith.constant 0 : index
      %c8_14 = arith.constant 8 : index
      %22 = vector.load %arg15[%c0_13, %c8_14] : memref<8x32xf32, #tpu.memory_space<vmem>>, vector<8x8xf32>
      tpu.vector_store %arg15[%c0_13, %c8_14], %21 {strides = array<i32>} : memref<8x32xf32, #tpu.memory_space<vmem>>, vector<8x8xf32>,
      %c2 = arith.constant 2 : index
      %c0_15 = arith.constant 0 : index
      %c0_16 = arith.constant 0 : index
      %23 = vector.load %arg14[%c2, %c0_15, %c0_16] : memref<4x8x1xf32, #tpu.memory_space<vmem>>, vector<1x8x1xf32>
      %24 = vector.shape_cast %23 : vector<1x8x1xf32> to vector<8x1xf32>
      %25 = tpu.reciprocal %24 {approx = true} : vector<8x1xf32> -> vector<8x1xf32>
      %c0_17 = arith.constant 0 : index
      %c16 = arith.constant 16 : index
      %26 = vector.load %arg15[%c0_17, %c16] : memref<8x32xf32, #tpu.memory_space<vmem>>, vector<8x8xf32>
      %27 = vector.broadcast %25 : vector<8x1xf32> to vector<8x8xf32>
      %28 = arith.mulf %26, %27 : vector<8x8xf32>
      %c0_18 = arith.constant 0 : index
      %c16_19 = arith.constant 16 : index
      %29 = vector.load %arg15[%c0_18, %c16_19] : memref<8x32xf32, #tpu.memory_space<vmem>>, vector<8x8xf32>
      tpu.vector_store %arg15[%c0_18, %c16_19], %28 {strides = array<i32>} : memref<8x32xf32, #tpu.memory_space<vmem>>, vector<8x8xf32>,
      %c3 = arith.constant 3 : index
      %c0_20 = arith.constant 0 : index
      %c0_21 = arith.constant 0 : index
      %30 = vector.load %arg14[%c3, %c0_20, %c0_21] : memref<4x8x1xf32, #tpu.memory_space<vmem>>, vector<1x8x1xf32>
      %31 = vector.shape_cast %30 : vector<1x8x1xf32> to vector<8x1xf32>
      %32 = tpu.reciprocal %31 {approx = true} : vector<8x1xf32> -> vector<8x1xf32>
      %c0_22 = arith.constant 0 : index
      %c24 = arith.constant 24 : index
      %33 = vector.load %arg15[%c0_22, %c24] : memref<8x32xf32, #tpu.memory_space<vmem>>, vector<8x8xf32>
      %34 = vector.broadcast %32 : vector<8x1xf32> to vector<8x8xf32>
      %35 = arith.mulf %33, %34 : vector<8x8xf32>
      %c0_23 = arith.constant 0 : index
      %c24_24 = arith.constant 24 : index
      %36 = vector.load %arg15[%c0_23, %c24_24] : memref<8x32xf32, #tpu.memory_space<vmem>>, vector<8x8xf32>
      tpu.vector_store %arg15[%c0_23, %c24_24], %35 {strides = array<i32>} : memref<8x32xf32, #tpu.memory_space<vmem>>, vector<8x8xf32>,
      %c0_25 = arith.constant 0 : index
      %c0_26 = arith.constant 0 : index
      %37 = vector.load %arg15[%c0_25, %c0_26] : memref<8x32xf32, #tpu.memory_space<vmem>>, vector<8x32xf32>
      %38 = arith.truncf %37 : vector<8x32xf32> to vector<8x32xbf16>
      %c0_27 = arith.constant 0 : index
      %c0_28 = arith.constant 0 : index
      %39 = vector.load %arg9[%c0_27, %c0_28] : memref<32x32xbf16, #tpu.memory_space<vmem>>, vector<32x32xbf16>
      %cst = arith.constant dense<0.000000e+00> : vector<8x32xf32>
      %40 = tpu.matmul %38, %39, %cst {dimension_numbers = #tpu.dot_dimension_numbers<[1], [0], [0], [1], [0, 0, 1, 1], [], []>} : vector<8x32xbf16>, vector<32x32xbf16>, vector<8x32xf32> -> vector<8x32xf32>
      %c0_29 = arith.constant 0 : index
      %c0_30 = arith.constant 0 : index
      %41 = vector.load %arg10[%c0_29, %c0_30] : memref<1x32xf32, #tpu.memory_space<vmem>>, vector<1x32xf32>
      %42 = vector.broadcast %41 : vector<1x32xf32> to vector<8x32xf32>
      %43 = arith.addf %40, %42 : vector<8x32xf32>
      %c0_31 = arith.constant 0 : index
      %c0_32 = arith.constant 0 : index
      %c0_33 = arith.constant 0 : index
      %44 = vector.load %arg11[%c0_31, %c0_32, %c0_33] : memref<1x8x32xf32, #tpu.memory_space<vmem>>, vector<1x8x32xf32>
      %45 = vector.shape_cast %44 : vector<1x8x32xf32> to vector<8x32xf32>
      %46 = vector.shape_cast %43 : vector<8x32xf32> to vector<1x8x32xf32>
      tpu.vector_store %arg11[%c0_31, %c0_32, %c0_33], %46 {strides = array<i32>} : memref<1x8x32xf32, #tpu.memory_space<vmem>>, vector<1x8x32xf32>,
    } else {
    }
    return
  }
  func.func @transform_0(%arg0: i32, %arg1: i32, %arg2: i32) -> (i32, i32, i32) {
    %c0_i32 = arith.constant 0 : i32
    %c0_i32_0 = arith.constant 0 : i32
    return %arg0, %arg1, %c0_i32 : i32, i32, i32
  }
  func.func @transform_1(%arg0: i32, %arg1: i32, %arg2: i32) -> (i32, i32, i32) {
    %c0_i32 = arith.constant 0 : i32
    %c0_i32_0 = arith.constant 0 : i32
    return %arg0, %arg2, %c0_i32 : i32, i32, i32
  }
  func.func @transform_2(%arg0: i32, %arg1: i32, %arg2: i32) -> (i32, i32) {
    %c0_i32 = arith.constant 0 : i32
    %c0_i32_0 = arith.constant 0 : i32
    %c0_i32_1 = arith.constant 0 : i32
    return %c0_i32, %c0_i32_0 : i32, i32
  }
  func.func @transform_3(%arg0: i32, %arg1: i32, %arg2: i32) -> (i32, i32) {
    %c0_i32 = arith.constant 0 : i32
    %c0_i32_0 = arith.constant 0 : i32
    %c0_i32_1 = arith.constant 0 : i32
    return %c0_i32, %c0_i32_0 : i32, i32
  }
  func.func @transform_4(%arg0: i32, %arg1: i32, %arg2: i32) -> (i32, i32) {
    %c0_i32 = arith.constant 0 : i32
    %c0_i32_0 = arith.constant 0 : i32
    %c0_i32_1 = arith.constant 0 : i32
    return %c0_i32, %c0_i32_0 : i32, i32
  }
  func.func @transform_5(%arg0: i32, %arg1: i32, %arg2: i32) -> (i32, i32) {
    %c0_i32 = arith.constant 0 : i32
    %c0_i32_0 = arith.constant 0 : i32
    %c0_i32_1 = arith.constant 0 : i32
    return %c0_i32, %c0_i32_0 : i32, i32
  }
  func.func @transform_6(%arg0: i32, %arg1: i32, %arg2: i32) -> (i32, i32) {
    %c0_i32 = arith.constant 0 : i32
    %c0_i32_0 = arith.constant 0 : i32
    %c0_i32_1 = arith.constant 0 : i32
    return %c0_i32, %c0_i32_0 : i32, i32
  }
  func.func @transform_7(%arg0: i32, %arg1: i32, %arg2: i32) -> (i32, i32) {
    %c0_i32 = arith.constant 0 : i32
    %c0_i32_0 = arith.constant 0 : i32
    %c0_i32_1 = arith.constant 0 : i32
    return %c0_i32, %c0_i32_0 : i32, i32
  }
  func.func @transform_8(%arg0: i32, %arg1: i32, %arg2: i32) -> (i32, i32, i32) {
    %c0_i32 = arith.constant 0 : i32
    %c0_i32_0 = arith.constant 0 : i32
    return %arg0, %arg1, %c0_i32 : i32, i32, i32
  }
}

</mosaic_0001>

<bundles_post_ra>
// kernel: multi_head_attention.1
= control target key start
LH: loop header
LB: loop body
LE: loop exit
PB: predicated region body
PF: predicated region fallthrough
CT: control target
= control target key end

     0   :  { %13 = vsyncpa [#allocation7], 0  ;;  %s2001_s0 = inlined_call_operand.vmem [shape: f32[2,8,32], index: 0, kind: input, shape index: {}, may-alias: {0,1}]   ;;  %s2002_s1 = inlined_call_operand.vmem [shape: f32[2,8,32], index: 1, kind: input, shape index: {}, may-alias: {0,1}]   ;;  %s2003_s2 = inlined_call_operand.vmem [shape: bf16[32,32], index: 2, kind: input, shape index: {}]   ;;  %s2004_s3 = inlined_call_operand.vmem [shape: f32[1,32], index: 3, kind: input, shape index: {}]   ;;  %s2005_s4 = inlined_call_operand.vmem [shape: bf16[32,64], index: 4, kind: input, shape index: {}]   ;;  %s2006_s5 = inlined_call_operand.vmem [shape: f32[1,64], index: 5, kind: input, shape index: {}]   ;;  %s2007_s6 = inlined_call_operand.vmem [shape: bf16[32,32], index: 6, kind: input, shape index: {}]   ;;  %s2008_s7 = inlined_call_operand.vmem [shape: f32[1,32], index: 7, kind: input, shape index: {}]   ;;  %s2009_s8 = inlined_call_operand.hbm [shape: f32[2,8,32], index: 8, kind: output, shape index: {}]  }
   0x1   :  { %15 = vsyncpa [#allocation7 + $0x1], 0  ;;  %s1687_s27 = smov 0   ;;  %s1689_s28 = smov 0  }
   0x2   :  { %s1691_s29 = smov 0   ;;  %s1693_s30 = smov 0  }
   0x3   :  { %s1695_s9 = smov 0   ;;  %s1697_s10 = smov 0  }
   0x4 LB: > { %s1315_s11 = sadd.s32 4294967295, %s1625_s10   ;;  %s1316_s12 = sadd.s32 4294967294, %s1625_s10   ;;  %s1625_s10 = sphi %s1697_s10, %s21_s10   ;;  %s1621_s9 = sphi %s1695_s9, %s2016_s9   ;;  %s1617_s30 = sphi %s1693_s30, %s2015_s30   ;;  %s1613_s29 = sphi %s1691_s29, %s2014_s29   ;;  %s1609_s28 = sphi %s1689_s28, %s2013_s28   ;;  %s1605_s27 = sphi %s1687_s27, %s2012_s27  }
   0x5   : > { %s40_s13 = sadd.s32 1, %s1621_s9  ;;  %s231_s14 = sadd.s32 1, %s1613_s29 }
   0x6   : > { %p42_p0 = scmp.ge.s32.totalorder %s40_s13, 2  ;;  %p241_p1 = scmp.ne.s32.totalorder %s1613_s29, %s1609_s28 }
   0x7   : > { %p242_p2 = scmp.eq.s32.totalorder %s1315_s11, 1  ;;  %p247_p3 = scmp.ne.s32.totalorder %s1609_s28, %s1605_s27 }
   0x8   : > { %s2018_s13 = smov (%p42_p0, %s40_s13), 0  ;;  %p248_p5 = scmp.eq.s32.totalorder %s1316_s12, 1 }
   0x9   : > { %p1727_p4 = por %p242_p2, %p241_p1  ;;  %s226_s16 = ssub.s32 %s1621_s9, %s2018_s13 }
   0xa   : > { %p1319_p6 = scmp.ge.s32.totalorder %s1625_s10, 1  ;;  %p229_p7 = scmp.eq.s32.totalorder %s226_s16, 0 }
   0xb   : > { %p1734_p8 = por %p248_p5, %p247_p3  ;;  %p304_p9 = scmp.lt.s32.totalorder %s1625_s10, 3 }
   0xc   : > { %s1740_s18 = scalar_select %p229_p7, %s1613_s29, %s231_s14  }
   0xd   : > { %p305_p10 = pnand %p1319_p6, %p304_p9 }
   0xe   : > { %v1516_v0 = vld [vmem:[%s2003_s2] sm:$0xff] (!%p305_p10)   ;;  %v1627_v1 = vmov (!%p305_p10), 0.0   ;;  %v1518_v3 = vld [vmem:[%s2003_s2 + $0x8] sm:$0xff] (!%p305_p10)   ;;  %vm1628_vm0 = vmmov (!%p305_p10), 0   ;;  %p347_p11 = scmp.lt.s32.totalorder (!%p305_p10), %s1617_s30, 1  ;;  %vm391_vm1 = vcmask (!%p305_p10), 261120   ;;  %v525_v36 = vlaneseq (!%p305_p10) }
   0xf   : > { %308 = sbr.rel (%p305_p10) target bundleno = 1513 (0x5e9), region = 52  ;;  %1373 = vmatprep.subr.bf16.mxu0 (!%p305_p10), %v1627_v1  ;;  %1381 = vmatprep.subr.bf16.mxu1 (!%p305_p10), %v1627_v1  ;;  %v1517_v2 = vld [vmem:[%s2005_s4] sm:$0xff] (!%p305_p10)   ;;  %v1519_v4 = vld [vmem:[%s2005_s4 + $0x8] sm:$0xff] (!%p305_p10)   ;;  %448 = vst.msk [vmem:[#allocation5] sm:$0xff] (!%p305_p10), %vm391_vm1, %v1627_v1  ;;  %vm535_vm2 = vcmask (!%p305_p10), 64512   ;;  %vm437_vm3 = vcmask (!%p305_p10), 257024  }
  0x10   : > { %1374 = vmatpush3.bf16.msra.mxu0 (!%p305_p10), %v1516_v0  ;;  %1377 = vmatprep.mubr.msk.bf16.mxu0 (!%p305_p10), %vm1628_vm0, %v1627_v1  ;;  %v1323_v9 = vld [vmem:[%s2004_s3] ss:$0 sm:$0xff] (!%p305_p10)  ;;  %s1631_s14 = smov (!%p305_p10), 104   ;;  %v526_v37 = vshrl.u32 (!%p305_p10), %v525_v36, 7  ;;  %v531_v38 = vand.u32 (!%p305_p10), 127, %v525_v36  ;;  %vm439_vm5 = vcmask (!%p305_p10), 7168  }
  0x11   : > { %1382 = vmatpush3.bf16.msra.mxu1 (!%p305_p10), %v1517_v2  ;;  %1375 = vmatprep.subr.bf16.mxu0 (!%p305_p10), %v1627_v1  ;;  %v1327_v10 = vld [vmem:[%s2006_s5] ss:$0 sm:$0xff] (!%p305_p10)  ;;  %v1632_v45 = vmov (!%p305_p10), -inf   ;;  %444 = vst.msk [vmem:[#allocation4] sm:$0xff] (!%p305_p10), %vm439_vm5, %v1627_v1  ;;  %445 = vst.msk [vmem:[#allocation4 + $0x8] sm:$0xff] (!%p305_p10), %vm439_vm5, %v1627_v1  ;;  %v1633_v46 = vmov (!%p305_p10), 0  }
  0x12   : > { %1383 = vmatprep.subr.bf16.mxu1 (!%p305_p10), %v1627_v1  ;;  %1385 = vmatprep.mubr.msk.bf16.mxu1 (!%p305_p10), %vm1628_vm0, %v1627_v1  ;;  %vm534_vm4 = vcmp.le.s32.totalorder (!%p305_p10), %v531_v38, %v526_v37  ;;  %440 = vst.msk [vmem:[#allocation3] sm:$0xff] (!%p305_p10), %vm439_vm5, %v1632_v45  ;;  %441 = vst.msk [vmem:[#allocation3 + $0x8] sm:$0xff] (!%p305_p10), %vm439_vm5, %v1632_v45  ;;  %s1634_s16 = smov (!%p305_p10), 96   ;;  %vm614_vm6 = vcmask (!%p305_p10), 1043456   ;;  %s1636_s20 = smov (!%p305_p10), 80   ;;  %vm808_vm7 = vcmask (!%p305_p10), 130112  }
  0x13   : > { %442 = vst.msk [vmem:[#allocation3 + $0x10] sm:$0xff] (!%p305_p10), %vm439_vm5, %v1632_v45  ;;  %443 = vst.msk [vmem:[#allocation3 + $0x18] sm:$0xff] (!%p305_p10), %vm439_vm5, %v1632_v45  ;;  %1514 = vset.pattern.permute.xlu1 (!%p305_p10), %v1633_v46  ;;  %1515 = vset.pattern.permute.xlu0 (!%p305_p10), %v1633_v46  ;;  %s1637_s21 = smov (!%p305_p10), 72   ;;  %s1639_s23 = smov (!%p305_p10), 16   ;;  %vm948_vm8 = vcmask (!%p305_p10), 195712   ;;  %vm1088_vm9 = vcmask (!%p305_p10), 261312  }
  0x14   : > { %1376 = vmatpush3.bf16.msra.mxu0 (!%p305_p10), %v1518_v3  ;;  %446 = vst.msk [vmem:[#allocation4 + $0x10] sm:$0xff] (!%p305_p10), %vm439_vm5, %v1627_v1  ;;  %447 = vst.msk [vmem:[#allocation4 + $0x18] sm:$0xff] (!%p305_p10), %vm439_vm5, %v1627_v1  ;;  %s1640_s24 = smov (!%p305_p10), 24  }
  0x15   : > { %1384 = vmatpush3.bf16.msra.mxu1 (!%p305_p10), %v1519_v4  ;;  %1389 = vmatprep.subr.bf16.mxu0 (!%p305_p10), %v1627_v1 }
  0x16   : > { %s348_s11 = scalar_select %p347_p11, %s1617_s30, 1  ;;  %1395 = vmatprep.subr.bf16.mxu1 %v1627_v1 }
  0x18   : > { %s1321_s12 = sshll.u32 %s348_s11, 3  ;;  %s1629_s11 = smov 120  }
  0x19   : > { %s353_s19 = scalar_lea.vmem %s2001_s0, %s1321_s12  ;;  %s360_s22 = scalar_lea.vmem %s2002_s1, %s1321_s12  ;;  %v1844_v2 = vld [vmem:[#allocation3] sm:$0xff] }
  0x1a   : > { %v366_v5 = vld [vmem:[%s353_s19] sm:$0xff]  ;;  %s1630_s12 = smov 112   ;;  %s1635_s19 = smov 88  }
  0x1b   : > { %v453_v6 = vld [vmem:[%s360_s22] sm:$0xff]  ;;  %v367_v7 = vpack.c.bf16 %v366_v5, %v366_v5  ;;  %s1638_s22 = smov 8  }
  0x1c   : > { %v454_v8 = vpack.c.bf16 %v453_v6, %v453_v6  ;;  %v1855_v6 = vld [vmem:[#allocation3 + $0x8] sm:$0xff] }
  0x1d   : > { %1378 = vmatmul.mubr.msk.bf16.vlgmr.msra.gmra.mrb[0].mxu0 %vm391_vm1, %v367_v7 }
  0x1e   : > { %1386 = vmatmul.mubr.msk.bf16.vlgmr.msra.gmra.mrb[0].mxu1 %vm391_vm1, %v454_v8  ;;  %1391 = vmatprep.mubr.msk.bf16.mxu0 %vm1628_vm0, %v1627_v1 }
  0x1f   : > { %1397 = vmatprep.mubr.msk.bf16.mxu1 %vm1628_vm0, %v1627_v1 }
  0xf0   : > { %v429_v11 = vpop.f32.mrb[0].mxu0 }
  0xf1   : > { %v516_v12 = vpop.f32.mrb[0].mxu1  ;;  %v430_v13 = vadd.f32 %v1323_v9, %v429_v11  ;;  %v1379_v14 = vpop.f32.mrb[1].mxu0 }
  0xf2   : > { %v517_v15 = vadd.f32 %v1327_v10, %v516_v12  ;;  %v1387_v16 = vpop.f32.mrb[1].mxu1  ;;  %v432_v17 = vpop.f32.mrb[2].mxu0  ;;  %v1865_v10 = vld [vmem:[#allocation3 + $0x10] sm:$0xff] }
  0xf3   : > { %v519_v18 = vpop.f32.mrb[2].mxu1  ;;  %v435_v19 = vmul.f32 0.17677669, %v430_v13  ;;  %v1380_v21 = vpop.f32.mrb[3].mxu0  ;;  %v1876_v16 = vld [vmem:[#allocation3 + $0x18] sm:$0xff] }
  0xf4   : > { %v1786_v20 = vpack.c.bf16 %v517_v15, %v517_v15  ;;  %v1388_v22 = vpop.f32.mrb[3].mxu1 }
  0xf5   : > { %v436_v23 = vpack.c.bf16 %v435_v19, %v435_v19 }
  0xf6   : > { %673 = vrot.lane.b32.xlu0 %v1786_v20, %s1629_s11  ;;  %v540_v24 = vsel %vm535_vm2, %v1786_v20, 0  ;;  %813 = vrot.lane.b32.xlu1 %v1786_v20, %s1630_s12 }
  0xf7   : > { %1390 = vmatpush3.bf16.xpose.msra.mxu0 %v540_v24  ;;  %438 = vst.msk [vmem:[#allocation2] sm:$0xf] %vm437_vm3, %v436_v23 }
  0xf8   : > { %1401 = vmatprep.subr.bf16.mxu0 %v1627_v1 }
  0xfe   : > { %v523_v25 = vld [vmem:[#allocation2] sm:$0xf] }
  0xff   : > { %1392 = vmatmul.mubr.msk.bf16.vlgmr.msra.gmra.mrb[4].mxu0 %vm535_vm2, %v523_v25  ;;  %v1333_v26 = vcombine.low %v523_v25, %v523_v25 }
 0x100   : > { %1403 = vmatprep.mubr.msk.bf16.mxu0 %vm1628_vm0, %v1627_v1 }
 0x101   : > { %811 = vrot.lane.b32.xlu1 %v1333_v26, %s1630_s12  ;;  %671 = vrot.lane.b32.xlu0 %v1333_v26, %s1629_s11  ;;  %s1641_s12 = smov [#allocation6]  }
 0x105   : > { %951 = vrot.lane.b32.xlu1 %v1333_v26, %s1631_s14  ;;  %953 = vrot.lane.b32.xlu0 %v1786_v20, %s1631_s14  ;;  %s344_s14 = sand.u32 1, %s1609_s28  }
 0x168   : > { %v674_v27 = vpop.permute.xlu0 %673  ;;  %v814_v29 = vpop.permute.xlu1 %813 }
 0x169   : > { %v679_v28 = vsel %vm535_vm2, %v674_v27, 0  ;;  %v819_v31 = vsel %vm535_vm2, %v814_v29, 0 }
 0x16a   : > { %1402 = vmatpush3.bf16.xpose.msra.mxu0 %v679_v28 }
 0x16b   : > { %1413 = vmatprep.subr.bf16.mxu0 %v1627_v1 }
 0x173   : > { %v672_v30 = vpop.permute.xlu0 %671  ;;  %v812_v33 = vpop.permute.xlu1 %811 }
 0x174   : > { %1404 = vmatmul.mubr.msk.bf16.vlgmr.msra.gmra.mrb[8].mxu0 %vm535_vm2, %v672_v30 }
 0x175   : > { %1414 = vmatpush3.bf16.xpose.msra.mxu0 %v819_v31  ;;  %1415 = vmatprep.mubr.msk.bf16.mxu0 %vm1628_vm0, %v1627_v1 }
 0x176   : > { %1425 = vmatprep.subr.bf16.mxu0 %v1627_v1 }
 0x177   : > { %v954_v32 = vpop.permute.xlu0 %953  ;;  %v952_v35 = vpop.permute.xlu1 %951 }
 0x178   : > { %v959_v34 = vsel %vm535_vm2, %v954_v32, 0 }
 0x17c   : > { %1416 = vmatmul.mubr.msk.bf16.vlgmr.msra.gmra.mrb[12].mxu0 %vm535_vm2, %v812_v33 }
 0x17d   : > { %1426 = vmatpush3.bf16.xpose.msra.mxu0 %v959_v34  ;;  %1427 = vmatprep.mubr.msk.bf16.mxu0 %vm1628_vm0, %v1627_v1 }
 0x17e   : > { %1437 = vmatprep.subr.bf16.mxu0 %v1627_v1 }
 0x184   : > { %1428 = vmatmul.mubr.msk.bf16.vlgmr.msra.gmra.mrb[16].mxu0 %vm535_vm2, %v952_v35 }
 0x185   : > { %1441 = vmatprep.mubr.msk.bf16.mxu0 %vm1628_vm0, %v1627_v1 }
 0x1d2   : > { %v576_v39 = vpop.f32.mrb[4].mxu0 }
 0x1d3   : > { %v1813_v40 = vsel %vm534_vm4, %v576_v39, -inf  ;;  %v1393_v41 = vpop.f32.mrb[5].mxu0 }
 0x1d4   : > { %v579_v42 = vpop.f32.mrb[6].mxu0  ;;  %v584_v43 = vsel %vm535_vm2, %v1813_v40, -inf }
 0x1d5   : > { %585 = vmax.xlane.f32.xlu0 %v584_v43  ;;  %v1394_v44 = vpop.f32.mrb[7].mxu0 }
 0x247   : > { %v715_v47 = vpop.f32.mrb[8].mxu0 }
 0x248   : > { %v1830_v48 = vsel %vm534_vm4, %v715_v47, -inf  ;;  %v1405_v49 = vpop.f32.mrb[9].mxu0 }
 0x249   : > { %v718_v50 = vpop.f32.mrb[10].mxu0  ;;  %v724_v51 = vsel %vm535_vm2, %v1830_v48, -inf }
 0x24a   : > { %725 = vmax.xlane.f32.xlu1 %v724_v51  ;;  %v1406_v52 = vpop.f32.mrb[11].mxu0 }
 0x24f   : > { %v855_v53 = vpop.f32.mrb[12].mxu0 }
 0x250   : > { %v1835_v54 = vsel %vm534_vm4, %v855_v53, -inf  ;;  %v1417_v55 = vpop.f32.mrb[13].mxu0 }
 0x251   : > { %v858_v56 = vpop.f32.mrb[14].mxu0  ;;  %v864_v57 = vsel %vm535_vm2, %v1835_v54, -inf }
 0x252   : > { %865 = vmax.xlane.f32.xlu0 %v864_v57  ;;  %v1418_v58 = vpop.f32.mrb[15].mxu0 }
 0x257   : > { %v995_v59 = vpop.f32.mrb[16].mxu0 }
 0x258   : > { %v1840_v60 = vsel %vm534_vm4, %v995_v59, -inf  ;;  %v1429_v61 = vpop.f32.mrb[17].mxu0 }
 0x259   : > { %v998_v62 = vpop.f32.mrb[18].mxu0  ;;  %v1004_v63 = vsel %vm535_vm2, %v1840_v60, -inf }
 0x25a   : > { %1005 = vmax.xlane.f32.xlu0 %v1004_v63  ;;  %v1430_v0 = vpop.f32.mrb[19].mxu0  ;;  %v740_v63 = vld [vmem:[#allocation4 + $0x8] sm:$0xff] }
 0x262   : > { %v586_v3 = vpop.xlane.xlu0 %585 }
 0x263   : > { %v1847_v4 = vmax.f32 %v1844_v2, %v586_v3 }
 0x265   : > { %v588_v5 = vsub.f32 %v1844_v2, %v1847_v4  ;;  %667 = vst.msk [vmem:[#allocation3] sm:$0xff] %vm439_vm5, %v1847_v4  ;;  %593 = vperm.xlu1 %1514, %v1847_v4  }
 0x267   : > { %v589_v47 = vmul.f32 1.442695, %v588_v5 }
 0x269   : > { %609 = vrot.lane.b32.xlu1 %v1786_v20, %s1634_s16  ;;  %s1320_s16 = sshll.u32 %s344_s14, 3 }
 0x2d7   : > { %v726_v7 = vpop.xlane.xlu1 %725 }
 0x2d8   : > { %v1858_v8 = vmax.f32 %v1855_v6, %v726_v7 }
 0x2da   : > { %v728_v9 = vsub.f32 %v1855_v6, %v1858_v8  ;;  %810 = vst.msk [vmem:[#allocation3 + $0x8] sm:$0xff] %vm439_vm5, %v1858_v8  ;;  %733 = vperm.xlu0 %1515, %v1858_v8   ;;  %v880_v6 = vld [vmem:[#allocation4 + $0x10] sm:$0xff] }
 0x2dc   : > { %v729_v51 = vmul.f32 1.442695, %v728_v9 }
 0x2df   : > { %v866_v11 = vpop.xlane.xlu0 %865 }
 0x2e0   : > { %v1868_v12 = vmax.f32 %v1865_v10, %v866_v11  ;;  %v658_v11 = vld [vmem:[#allocation5] sm:$0xff] }
 0x2e2   : > { %v868_v13 = vsub.f32 %v1865_v10, %v1868_v12  ;;  %950 = vst.msk [vmem:[#allocation3 + $0x10] sm:$0xff] %vm439_vm5, %v1868_v12  ;;  %873 = vperm.xlu1 %1514, %v1868_v12  }
 0x2e4   : > { %v594_v14 = vpop.permute.xlu1 %593  ;;  %v869_v62 = vmul.f32 1.442695, %v868_v13  ;;  %v1020_v13 = vld [vmem:[#allocation4 + $0x18] sm:$0xff] }
 0x2e5   : > { %v596_v15 = vsub.f32 %v1813_v40, %v594_v14 }
 0x2e6   : > { %748 = vrot.lane.b32.xlu1 %v1786_v20, %s1635_s19 }
 0x2e7   : > { %v597_v17 = vmul.f32 1.442695, %v596_v15  ;;  %v1006_v18 = vpop.xlane.xlu0 %1005 }
 0x2e8   : > { %v1880_v19 = vmax.f32 %v1876_v16, %v1006_v18  ;;  %v610_v21 = vpop.permute.xlu1 %609 }
 0x2e9   : > { %1523 = vpow2.f32 %v597_v17  ;;  %v616_v22 = vsel %vm614_vm6, %v610_v21, 0 }
 0x2ea   : > { %v1008_v23 = vsub.f32 %v1876_v16, %v1880_v19  ;;  %1090 = vst.msk [vmem:[#allocation3 + $0x18] sm:$0xff] %vm439_vm5, %v1880_v19  ;;  %1396 = vmatpush3.bf16.msra.mxu1 %v616_v22  ;;  %1013 = vperm.xlu1 %1514, %v1880_v19  }
 0x2eb   : > { %1407 = vmatprep.subr.bf16.mxu1 %v1627_v1 }
 0x2ec   : > { %v1009_v0 = vmul.f32 1.442695, %v1008_v23 }
 0x2ee   : > { %888 = vrot.lane.b32.xlu1 %v1786_v20, %s1636_s20 }
 0x2f2   : > { %1028 = vrot.lane.b32.xlu1 %v1786_v20, %s1637_s21  ;;  %s1345_s21 = sshll.u32 %s1617_s30, 7  ;;  %s1212_s30 = scalar_lea.sflag [#allocation7], %s344_s14 }
 0x2f3   : > { %v1524_v24 = vpop.eup %1523  ;;  %s1953_s26 = scalar_lea.hbm %s2009_s8, %s1345_s21 }
 0x2f4   : > { %v607_v25 = vpack.c.bf16 %v1524_v24, %v1524_v24  ;;  %v601_v26 = vsel %vm535_vm2, %v1524_v24, 0.0 }
 0x2f6   : > { %1398 = vmatmul.mubr.msk.bf16.vlgmr.msra.gmra.mrb[4].mxu1 %vm535_vm2, %v607_v25 }
 0x2f7   : > { %1409 = vmatprep.mubr.msk.bf16.mxu1 %vm1628_vm0, %v1627_v1 }
 0x316   : > { %602 = vadd.xlane.f32.xlu1 %v601_v26 }
 0x359   : > { %v734_v27 = vpop.permute.xlu0 %733 }
 0x35a   : > { %v736_v28 = vsub.f32 %v1830_v48, %v734_v27 }
 0x35c   : > { %v737_v29 = vmul.f32 1.442695, %v736_v28 }
 0x35e   : > { %1525 = vpow2.f32 %v737_v29 }
 0x361   : > { %v874_v30 = vpop.permute.xlu1 %873 }
 0x362   : > { %v876_v31 = vsub.f32 %v1835_v54, %v874_v30  ;;  %v599_v54 = vld [vmem:[#allocation4] sm:$0xff] }
 0x364   : > { %v877_v32 = vmul.f32 1.442695, %v876_v31 }
 0x365   : > { %v749_v20 = vpop.permute.xlu1 %748 }
 0x366   : > { %1527 = vpow2.f32 %v877_v32  ;;  %v754_v33 = vsel %vm614_vm6, %v749_v20, 0 }
 0x367   : > { %1408 = vmatpush3.bf16.msra.mxu1 %v754_v33 }
 0x368   : > { %v1526_v34 = vpop.eup %1525  ;;  %1419 = vmatprep.subr.bf16.mxu1 %v1627_v1 }
 0x369   : > { %v1014_v35 = vpop.permute.xlu1 %1013  ;;  %v742_v36 = vsel %vm535_vm2, %v1526_v34, 0.0  ;;  %v747_v37 = vpack.c.bf16 %v1526_v34, %v1526_v34 }
 0x36a   : > { %v1016_v38 = vsub.f32 %v1840_v60, %v1014_v35  ;;  %743 = vadd.xlane.f32.xlu0 %v742_v36 }
 0x36b   : > { %1410 = vmatmul.mubr.msk.bf16.vlgmr.msra.gmra.mrb[8].mxu1 %vm535_vm2, %v747_v37 }
 0x36c   : > { %v1017_v39 = vmul.f32 1.442695, %v1016_v38  ;;  %1421 = vmatprep.mubr.msk.bf16.mxu1 %vm1628_vm0, %v1627_v1 }
 0x36d   : > { %v889_v40 = vpop.permute.xlu1 %888 }
 0x36e   : > { %1529 = vpow2.f32 %v1017_v39  ;;  %v894_v41 = vsel %vm614_vm6, %v889_v40, 0  ;;  %v1521_v39 = vld [vmem:[%s2007_s6] sm:$0xff]   ;;  %v1522_v40 = vld [vmem:[%s2007_s6 + $0x8] sm:$0xff]  }
 0x36f   : > { %1420 = vmatpush3.bf16.msra.mxu1 %v894_v41  ;;  %1531 = vpow2.f32 %v589_v47  ;;  %1438 = vmatpush3.bf16.msra.mxu0 %v1521_v39 }
 0x370   : > { %v1528_v42 = vpop.eup %1527  ;;  %1431 = vmatprep.subr.bf16.mxu1 %v1627_v1  ;;  %1533 = vpow2.f32 %v729_v51  ;;  %1439 = vmatprep.subr.bf16.mxu0 %v1627_v1 }
 0x371   : > { %v1029_v43 = vpop.permute.xlu1 %1028  ;;  %v882_v44 = vsel %vm535_vm2, %v1528_v42, 0.0  ;;  %v887_v45 = vpack.c.bf16 %v1528_v42, %v1528_v42  ;;  %1535 = vpow2.f32 %v869_v62 }
 0x372   : > { %v1034_v46 = vsel %vm614_vm6, %v1029_v43, 0  ;;  %883 = vadd.xlane.f32.xlu1 %v882_v44  ;;  %1537 = vpow2.f32 %v1009_v0 }
 0x373   : > { %1422 = vmatmul.mubr.msk.bf16.vlgmr.msra.gmra.mrb[12].mxu1 %vm535_vm2, %v887_v45  ;;  %1440 = vmatpush3.bf16.msra.mxu0 %v1522_v40 }
 0x374   : > { %1432 = vmatpush3.bf16.msra.mxu1 %v1034_v46  ;;  %1433 = vmatprep.mubr.msk.bf16.mxu1 %vm1628_vm0, %v1627_v1 }
 0x378   : > { %v1530_v48 = vpop.eup %1529 }
 0x379   : > { %v1022_v49 = vsel %vm535_vm2, %v1530_v48, 0.0  ;;  %v1027_v50 = vpack.c.bf16 %v1530_v48, %v1530_v48  ;;  %v1532_v52 = vpop.eup %1531 }
 0x37a   : > { %1023 = vadd.xlane.f32.xlu0 %v1022_v49  ;;  %v1534_v53 = vpop.eup %1533  ;;  %v600_v55 = vmul.f32 %v1532_v52, %v599_v54 }
 0x37b   : > { %1434 = vmatmul.mubr.msk.bf16.vlgmr.msra.gmra.mrb[16].mxu1 %vm535_vm2, %v1027_v50  ;;  %v741_v2 = vmul.f32 %v1534_v53, %v740_v63  ;;  %v1536_v5 = vpop.eup %1535 }
 0x37c   : > { %v881_v7 = vmul.f32 %v1536_v5, %v880_v6  ;;  %v1538_v10 = vpop.eup %1537  ;;  %v1340_v6 = vld [vmem:[%s2008_s7] ss:$0 sm:$0xff] }
 0x37d   : > { %v1021_v16 = vmul.f32 %v1538_v10, %v1020_v13 }
 0x383   : > { %661 = vperm.xlu1 %1514, %v1532_v52  }
 0x390   : > { %799 = vperm.xlu0 %1515, %v1534_v53  }
 0x3a3   : > { %v603_v56 = vpop.xlane.xlu1 %602 }
 0x3a4   : > { %v604_v57 = vadd.f32 %v603_v56, %v600_v55 }
 0x3a6   : > { %606 = vst.msk [vmem:[#allocation4] sm:$0xff] %vm439_vm5, %v604_v57 }
 0x3ad   : > { %v1094_v19 = vld [vmem:[#allocation4] sm:$0xff] }
 0x3ae   : > { %1539 = vrcp.f32 %v1094_v19 }
 0x3b8   : > { %v1540_v32 = vpop.eup %1539 }
 0x3c9   : > { %v652_v58 = vpop.f32.mrb[4].mxu1 }
 0x3ca   : > { %v1399_v59 = vpop.f32.mrb[5].mxu1 }
 0x3cb   : > { %v655_v60 = vpop.f32.mrb[6].mxu1 }
 0x3cc   : > { %v1400_v61 = vpop.f32.mrb[7].mxu1 }
 0x3f7   : > { %v744_v3 = vpop.xlane.xlu0 %743 }
 0x3f8   : > { %v745_v4 = vadd.f32 %v744_v3, %v741_v2 }
 0x3fa   : > { %746 = vst.msk [vmem:[#allocation4 + $0x8] sm:$0xff] %vm439_vm5, %v745_v4 }
 0x3ff   : > { %v884_v8 = vpop.xlane.xlu1 %883 }
 0x400   : > { %v885_v9 = vadd.f32 %v884_v8, %v881_v7 }
 0x401   : > { %v1106_v26 = vld [vmem:[#allocation4 + $0x8] sm:$0xff] }
 0x402   : > { %886 = vst.msk [vmem:[#allocation4 + $0x10] sm:$0xff] %vm439_vm5, %v885_v9 }
 0x403   : > { %v662_v12 = vpop.permute.xlu1 %661 }
 0x404   : > { %v664_v14 = vmul.f32 %v662_v12, %v658_v11 }
 0x406   : > { %v665_v15 = vadd.f32 %v664_v14, %v652_v58 }
 0x407   : > { %v1024_v17 = vpop.xlane.xlu0 %1023 }
 0x408   : > { %666 = vst.msk [vmem:[#allocation5] sm:$0xff] %vm535_vm2, %v665_v15  ;;  %v1025_v18 = vadd.f32 %v1024_v17, %v1021_v16 }
 0x409   : > { %v1118_v25 = vld [vmem:[#allocation4 + $0x10] sm:$0xff] }
 0x40a   : > { %1026 = vst.msk [vmem:[#allocation4 + $0x18] sm:$0xff] %vm439_vm5, %v1025_v18  ;;  %1541 = vrcp.f32 %v1118_v25 }
 0x40b   : > { %1543 = vrcp.f32 %v1106_v26 }
 0x40f   : > { %v796_v41 = vld [vmem:[#allocation5] sm:$0xff]  ;;  %v800_v42 = vpop.permute.xlu0 %799 }
 0x410   : > { %v802_v43 = vmul.f32 %v800_v42, %v796_v41 }
 0x411   : > { %v1130_v31 = vld [vmem:[#allocation4 + $0x18] sm:$0xff] }
 0x412   : > { %1545 = vrcp.f32 %v1130_v31 }
 0x414   : > { %v1542_v20 = vpop.eup %1541 }
 0x415   : > { %v1544_v37 = vpop.eup %1543 }
 0x41c   : > { %v1546_v38 = vpop.eup %1545 }
 0x43e   : > { %v790_v21 = vpop.f32.mrb[8].mxu1 }
 0x43f   : > { %804 = vrot.lane.b32.xlu1 %v790_v21, %s1638_s22  ;;  %v1411_v22 = vpop.f32.mrb[9].mxu1  ;;  %s346_s22 = scalar_lea.vmem [#allocation6], %s1320_s16  ;;  %s1551_s16 = sshll.u32 %s1641_s12, 4  ;;  %s1552_s16 = int_to_ptr.vmem [resolvable:$false] %s1551_s16 }
 0x440   : > { %v793_v23 = vpop.f32.mrb[10].mxu1  ;;  %s1553_s19 = scalar_lea.vmem %s1552_s16, 256 }
 0x441   : > { %v1412_v24 = vpop.f32.mrb[11].mxu1 }
 0x443   : > { %939 = vperm.xlu1 %1514, %v1536_v5  }
 0x446   : > { %v930_v27 = vpop.f32.mrb[12].mxu1 }
 0x447   : > { %1079 = vperm.xlu1 %1514, %v1538_v10   ;;  %v1423_v28 = vpop.f32.mrb[13].mxu1  ;;  %944 = vrot.lane.b32.xlu0 %v930_v27, %s1639_s23  ;;  %s1226_s23 = sshll.u32 %s346_s22, 4  ;;  %s1955_s23 = int_to_ptr.vmem [resolvable:$true] %s1226_s23 }
 0x448   : > { %v933_v29 = vpop.f32.mrb[14].mxu1  ;;  %s1547_s11 = scalar_lea.vmem %s1955_s23, 128  ;;  %p1554_p1 = scmp.lt.s32.totalorder %s1955_s23, %s1552_s16 }
 0x449   : > { %v1424_v30 = vpop.f32.mrb[15].mxu1  ;;  %p1548_p12 = scmp.ne.s32.totalorder %s1955_s23, %s1547_s11  ;;  %p1555_p2 = scmp.lt.s32.totalorder %s1553_s19, %s1547_s11 }
 0x44b   : > { %1099 = vperm.xlu1 %1514, %v1540_v32   ;;  %p1549_p13 = pnand %p1548_p12, %p1727_p4  ;;  %p1556_p3 = por %p1555_p2, %p1554_p1 }
 0x44d   : > { %p1550_p0 = pneg %p1549_p13 }
 0x44e   : > { %v1070_v33 = vpop.f32.mrb[16].mxu1 }
 0x44f   : > { %1123 = vperm.xlu1 %1514, %v1542_v20   ;;  %v1435_v34 = vpop.f32.mrb[17].mxu1  ;;  %1084 = vrot.lane.b32.xlu0 %v1070_v33, %s1640_s24  ;;  %p1557_p5 = pnand %p1556_p3, %p1550_p0 }
 0x450   : > { %v1073_v35 = vpop.f32.mrb[18].mxu1 }
 0x451   : > { %v1436_v36 = vpop.f32.mrb[19].mxu1 }
 0x453   : > { %1111 = vperm.xlu0 %1515, %v1544_v37  }
 0x457   : > { %1135 = vperm.xlu0 %1515, %v1546_v38  }
 0x4b1   : > { %v805_v44 = vpop.permute.xlu1 %804 }
 0x4b2   : > { %v807_v45 = vadd.f32 %v805_v44, %v802_v43 }
 0x4b4   : > { %809 = vst.msk [vmem:[#allocation5] sm:$0xff] %vm808_vm7, %v807_v45 }
 0x4b9   : > { %v945_v49 = vpop.permute.xlu0 %944 }
 0x4bb   : > { %v936_v47 = vld [vmem:[#allocation5] sm:$0xff] }
 0x4c1   : > { %v1085_v53 = vpop.permute.xlu0 %1084 }
 0x4c2   : > { %v940_v46 = vpop.permute.xlu1 %939 }
 0x4c3   : > { %v942_v48 = vmul.f32 %v940_v46, %v936_v47 }
 0x4c5   : > { %v947_v50 = vadd.f32 %v945_v49, %v942_v48 }
 0x4c6   : > { %v1080_v51 = vpop.permute.xlu1 %1079 }
 0x4c7   : > { %949 = vst.msk [vmem:[#allocation5] sm:$0xff] %vm948_vm8, %v947_v50 }
 0x4ca   : > { %v1100_v55 = vpop.permute.xlu1 %1099 }
 0x4ce   : > { %v1076_v52 = vld [vmem:[#allocation5] sm:$0xff]  ;;  %v1124_v61 = vpop.permute.xlu1 %1123 }
 0x4cf   : > { %v1082_v1 = vmul.f32 %v1080_v51, %v1076_v52 }
 0x4d1   : > { %v1087_v54 = vadd.f32 %v1085_v53, %v1082_v1 }
 0x4d2   : > { %v1112_v59 = vpop.permute.xlu0 %1111 }
 0x4d3   : > { %1089 = vst.msk [vmem:[#allocation5] sm:$0xff] %vm1088_vm9, %v1087_v54 }
 0x4d6   : > { %v1136_v2 = vpop.permute.xlu0 %1135 }
 0x4da   : > { %v1096_v56 = vld [vmem:[#allocation5] sm:$0xff] }
 0x4db   : > { %v1102_v57 = vmul.f32 %v1100_v55, %v1096_v56 }
 0x4dd   : > { %1104 = vst.msk [vmem:[#allocation5] sm:$0xff] %vm535_vm2, %v1102_v57 }
 0x4e4   : > { %v1108_v58 = vld [vmem:[#allocation5] sm:$0xff] }
 0x4e5   : > { %v1114_v60 = vmul.f32 %v1112_v59, %v1108_v58 }
 0x4e7   : > { %1116 = vst.msk [vmem:[#allocation5] sm:$0xff] %vm808_vm7, %v1114_v60 }
 0x4ee   : > { %v1120_v62 = vld [vmem:[#allocation5] sm:$0xff] }
 0x4ef   : > { %v1126_v63 = vmul.f32 %v1124_v61, %v1120_v62 }
 0x4f1   : > { %1128 = vst.msk [vmem:[#allocation5] sm:$0xff] %vm948_vm8, %v1126_v63 }
 0x4f8   : > { %v1132_v0 = vld [vmem:[#allocation5] sm:$0xff] }
 0x4f9   : > { %v1138_v3 = vmul.f32 %v1136_v2, %v1132_v0 }
 0x4fb   : > { %1140 = vst.msk [vmem:[#allocation5] sm:$0xff] %vm1088_vm9, %v1138_v3 }
 0x502   : > { %v1141_v4 = vld [vmem:[#allocation5] sm:$0xff] }
 0x503   : > { %v1142_v5 = vpack.c.bf16 %v1141_v4, %v1141_v4 }
 0x505   : > { %1442 = vmatmul.mubr.msk.bf16.vlgmr.msra.gmra.mrb[20].mxu0 %vm391_vm1, %v1142_v5 }
 0x5d8   : > { %v1204_v7 = vpop.f32.mrb[20].mxu0 }
 0x5d9   : > { %v1205_v8 = vadd.f32 %v1340_v6, %v1204_v7  ;;  %v1443_v9 = vpop.f32.mrb[21].mxu0 }
 0x5da   : > { %v1207_v11 = vpop.f32.mrb[22].mxu0 }
 0x5db   : > { %v1444_v10 = vpop.f32.mrb[23].mxu0  ;;  %1210 = vst.msk [vmem:[%s346_s22] sm:$0xff] %vm391_vm1, %v1205_v8 }
 0x5dc   : > { %1560 = shalt.err (!%p1557_p5)
}
 0x5dd   : > { %s1561_s14 = scalar_lea.hbm %s1953_s26, 128  ;;  %s1565_s22 = scalar_lea.hbm %s2009_s8, 256 }
 0x5de   : > { %p1562_p6 = scmp.ne.s32.totalorder %s1953_s26, %s1561_s14  ;;  %p1566_p10 = scmp.lt.u32.totalorder %s1953_s26, %s2009_s8 }
 0x5df   : > { %p1567_p11 = scmp.lt.u32.totalorder %s1565_s22, %s1561_s14  ;;  %p1569_p13 = scmp.lt.u32.totalorder %s1561_s14, %s1953_s26 }
 0x5e0   : > { %p1563_p7 = pnand %p1562_p6, %p1727_p4 }
 0x5e1   : > { %p1568_p12 = por %p1567_p11, %p1566_p10 }
 0x5e2   : > { %p1564_p9 = pneg %p1563_p7 }
 0x5e3   : > { %p1570_p0 = por %p1569_p13, %p1568_p12 }
 0x5e5   : > { %p1571_p1 = pnand %p1570_p0, %p1564_p9 }
 0x5e7   : > { %1574 = shalt.err (!%p1571_p1)
}
 0x5e8   : > { %1445 = dma.vmem_to_hbm [thread:$0]  (%p1727_p4), %s1955_s23, 128, %s1953_s26, %s1212_s30  }
 0x5e9 PF: > { %p1451_p2 = scmp.ge.s32.totalorder %s1625_s10, 2  ;;  %s1238_s11 = sand.u32 1, %s1605_s27  }
 0x5ea   : > { %s1239_s12 = scalar_lea.sflag [#allocation7], %s1238_s11 }
 0x5eb   : > { %p1448_p3 = pnand %p1451_p2, %p1734_p8 }
 0x5ed   : > { %1600 = dma.done.wait (!%p1448_p3), %s1239_s12, 128  }
 0x5ee   : > { %1602 = vsyncadd (!%p1448_p3), %s1239_s12, 4294967168  ;;  %s21_s10 = sadd.s32 1, %s1625_s10   ;;  %s2012_s27 = smov %s1609_s28 }
 0x5ef   : > { %p18_p5 = scmp.ge.s32.totalorder %s21_s10, 4   ;;  %s2013_s28 = smov %s1613_s29 }
 0x5f0   : > { %s2014_s29 = smov %s1740_s18  ;;  %s2015_s30 = smov %s1621_s9 }
 0x5f1   : > { %s2016_s9 = smov %s2018_s13  ;;  %20 = sbr.rel (!%p18_p5) target bundleno = 4 (0x4), region = 111 }
 0x5f8   :  { %1244 = vsyncpa [#allocation7], 1 }
 0x5f9   :  { %1246 = vsyncpa [#allocation7 + $0x1], 1 }

</bundles_post_ra>
